<compile_context>
chip_gen: v7x
topology: tpu7x:2x2x1
jax: 0.10.0
libtpu: 0.0.40
codegen_flags: <defaults>
</compile_context>

<pallas_src>
import functools

import jax
import jax.numpy as jnp
from jax import lax
from jax.experimental import pallas as pl
from jax.experimental.pallas import tpu as pltpu


def _revised_focal_loss_kernel(logits_ref, tgt_ref, out_ref, *,
                               alpha, delta, offset, total_n, tile_n):
    raw = logits_ref[...]                                     # (TILE_N, C) input dtype
    tgt = tgt_ref[...]                                        # (TILE_N, 1) int32
    tn, c = raw.shape

    col_ids = lax.broadcasted_iota(jnp.int32, (tn, c), 1)     # (TILE_N, C)

    # Gather the target logit and the row max straight from the raw tile (both are
    # exact in any float dtype), BEFORE building any full-tile f32 temporary.  The
    # cast -> subtract -> exp -> sum chain below is then the only full-tile consumer.
    tgt_logit = jnp.sum(jnp.where(col_ids == tgt, raw, 0),
                        axis=-1, keepdims=True).astype(jnp.float32)   # (TILE_N, 1)
    row_max = jnp.max(raw, axis=-1, keepdims=True).astype(jnp.float32)

    sum_exp = jnp.sum(jnp.exp(raw.astype(jnp.float32) - row_max),
                      axis=-1, keepdims=True)                  # (TILE_N, 1)

    # Numerically-stable cross entropy per row, in shifted space.
    tgt_shifted = tgt_logit - row_max
    ce = jnp.log(sum_exp) - tgt_shifted                       # per-sample CE
    pt = jnp.exp(-ce)                                          # softmax prob of target
    weight = jnp.exp(-((pt - offset) ** 2) / delta)
    per_sample = alpha * weight * ce                           # (TILE_N, 1)

    # Mask rows past the true batch size (ragged last tile reads padded garbage).
    # Select (not multiply) so NaN/Inf in padded rows cannot propagate.
    row_ids = (pl.program_id(0) * tile_n
               + lax.broadcasted_iota(jnp.int32, (tn, 1), 0))
    per_sample = jnp.where(row_ids < total_n, per_sample, 0.0)

    out_ref[...] = jnp.sum(per_sample).reshape(1, 1, 1)


# Scoped-VMEM planning: the budget must hold on v7x (64 MiB physical) as well as
# v5e/v6e (128 MiB).  We budget tile memory at ~36 MiB and raise the scoped limit
# to 48 MiB so the compiler has headroom without risking v7x's physical capacity.
_TILE_VMEM_BUDGET = 36 * 1024 * 1024
_VMEM_LIMIT_BYTES = 48 * 1024 * 1024


def _choose_tile_n(n, c, itemsize):
    """Largest batch tile whose full VMEM footprint fits the budget on every chip."""
    # sublane packing: 8 rows for 4-byte, 16 for 2-byte, 32 for 1-byte dtypes.
    sublane = 8 * max(1, 4 // max(1, min(4, itemsize)))
    per_row = 2 * c * itemsize          # double-buffered logits tile
    per_row += 10 * c                   # ~2.5x tile of f32 in-kernel intermediates
    per_row += 2 * 128 * 4              # int32 targets, lane-padded to 128, x2 buffers
    tile = max(sublane, (_TILE_VMEM_BUDGET // per_row) // sublane * sublane)
    n_pad = ((n + sublane - 1) // sublane) * sublane
    tile = int(min(tile, n_pad, 32768))
    # v7x has 2 TensorCores: keep at least 2 grid steps so "parallel" can shard.
    if tile >= n and n > sublane:
        half = (n + 1) // 2
        tile = ((half + sublane - 1) // sublane) * sublane
    return max(sublane, tile)


def _reference(outputs, targets, alpha=0.25, delta=0.5, offset=0.3):
    # Pure-JAX reference mirroring torch.nn.functional.cross_entropy(reduction='none')
    logp = jax.nn.log_softmax(outputs.astype(jnp.float32), axis=-1)
    ce = -jnp.take_along_axis(logp, targets[:, None].astype(jnp.int32), axis=-1)[:, 0]
    pt = jnp.exp(-ce)
    w = jnp.exp(-((pt - offset) ** 2) / delta)
    return jnp.mean(alpha * w * ce)


def revised_focal_loss(outputs, targets, *, alpha=0.25, delta=0.5, offset=0.3,
                       tile_n=None, use_pallas=None):
    """outputs: (N, C) float logits; targets: (N,) integer class indices."""
    n, c = outputs.shape

    # Tiny problems: fixed pallas_call launch/DMA overhead dwarfs the work; let
    # XLA fuse it.  `use_pallas=True` forces the kernel (used by the self-test).
    if use_pallas is None:
        use_pallas = outputs.size * outputs.dtype.itemsize >= (256 * 1024)
    if not use_pallas:
        return _reference(outputs, targets, alpha, delta, offset)

    if tile_n is None:
        tile_n = _choose_tile_n(n, c, outputs.dtype.itemsize)
    grid = pl.cdiv(n, tile_n)

    kernel = functools.partial(
        _revised_focal_loss_kernel,
        alpha=float(alpha), delta=float(delta), offset=float(offset),
        total_n=n, tile_n=tile_n,
    )

    partials = pl.pallas_call(
        kernel,
        out_shape=jax.ShapeDtypeStruct((grid, 1, 1), jnp.float32),
        grid=(grid,),
        in_specs=[
            pl.BlockSpec((tile_n, c), lambda i: (i, 0)),   # logits tile (input dtype)
            pl.BlockSpec((tile_n, 1), lambda i: (i, 0)),   # targets tile (int32)
        ],
        out_specs=pl.BlockSpec((1, 1, 1), lambda i: (i, 0, 0)),   # per-tile partial sum
        compiler_params=pltpu.CompilerParams(
            dimension_semantics=("parallel",),
            vmem_limit_bytes=_VMEM_LIMIT_BYTES,
        ),
    )(outputs, targets.astype(jnp.int32).reshape(n, 1))

    # Final tiny reduction + divide by the TOTAL batch size (not the tile size).
    return jnp.sum(partials) / jnp.float32(n)


if __name__ == "__main__":
    key = jax.random.PRNGKey(0)
    k1, k2, k3, k4 = jax.random.split(key, 4)

    # Case 1: small f32 problem (single tile).
    N, C = 8, 32
    outputs = jax.random.normal(k1, (N, C), dtype=jnp.float32)
    targets = jax.random.randint(k2, (N,), 0, C, dtype=jnp.int32)
    loss = revised_focal_loss(outputs, targets, use_pallas=True)
    jax.block_until_ready(loss)
    ref = _reference(outputs, targets)
    assert jnp.allclose(loss, ref, atol=1e-5, rtol=1e-5), (loss, ref)

    # Case 2: bf16 logits, auto tile sizing (grid split into >=2 steps, ragged last tile).
    N2, C2 = 300, 128
    outputs2 = (jax.random.normal(k3, (N2, C2), dtype=jnp.float32) * 3.0).astype(jnp.bfloat16)
    targets2 = jax.random.randint(k4, (N2,), 0, C2, dtype=jnp.int32)
    loss2 = revised_focal_loss(outputs2, targets2, use_pallas=True)
    jax.block_until_ready(loss2)
    ref2 = _reference(outputs2, targets2)
    assert jnp.allclose(loss2, ref2, atol=5e-5, rtol=1e-4), (loss2, ref2)

    # Case 3: same data, explicit small tile -> 3-step grid with a ragged last tile.
    loss3 = revised_focal_loss(outputs2, targets2, use_pallas=True, tile_n=128)
    jax.block_until_ready(loss3)
    assert jnp.allclose(loss3, ref2, atol=5e-5, rtol=1e-4), (loss3, ref2)

    print("KERNEL_OK")
</pallas_src>

<mosaic_0001>
module attributes {stable_mosaic.version = 11 : i64} {
  func.func @_revised_focal_loss_kernel(%arg0: i32, %arg1: memref<8x32xf32, #tpu.memory_space<vmem>>, %arg2: memref<8x1xi32, #tpu.memory_space<vmem>>, %arg3: memref<1x1x1xf32, #tpu.memory_space<vmem>>) attributes {dimension_semantics = [#tpu.dimension_semantics<parallel>], iteration_bounds = array<i64: 1>, scalar_prefetch = 0 : i64, scratch_operands = 0 : i64, tpu.core_type = #tpu.core_type<tc>, window_params = [{transform_indices = @transform_0, window_bounds = array<i64: 8, 32>}, {transform_indices = @transform_1, window_bounds = array<i64: 8, 1>}, {transform_indices = @transform_2, window_bounds = array<i64: 1, 1, 1>}]} {
    %c0 = arith.constant 0 : index
    %c0_0 = arith.constant 0 : index
    %0 = vector.load %arg1[%c0, %c0_0] : memref<8x32xf32, #tpu.memory_space<vmem>>, vector<8x32xf32>
    %c0_1 = arith.constant 0 : index
    %c0_2 = arith.constant 0 : index
    %1 = vector.load %arg2[%c0_1, %c0_2] : memref<8x1xi32, #tpu.memory_space<vmem>>, vector<8x1xi32>
    %2 = tpu.iota {dimensions = array<i32: 1>} : vector<8x32xi32>
    %3 = vector.broadcast %1 : vector<8x1xi32> to vector<8x32xi32>
    %4 = arith.cmpi eq, %2, %3 : vector<8x32xi32>
    %c0_i32 = arith.constant 0 : i32
    %5 = arith.sitofp %c0_i32 : i32 to f32
    %6 = vector.broadcast %5 : f32 to vector<8x32xf32>
    %7 = arith.select %4, %0, %6 : vector<8x32xi1>, vector<8x32xf32>
    %cst = arith.constant dense<0.000000e+00> : vector<8xf32>
    %8 = vector.multi_reduction <add>, %7, %cst [1] : vector<8x32xf32> to vector<8xf32>
    %9 = vector.shape_cast %8 : vector<8xf32> to vector<8x1xf32>
    %cst_3 = arith.constant dense<0xFF800000> : vector<8xf32>
    %10 = vector.multi_reduction <maximumf>, %0, %cst_3 [1] : vector<8x32xf32> to vector<8xf32>
    %11 = vector.shape_cast %10 : vector<8xf32> to vector<8x1xf32>
    %12 = vector.broadcast %11 : vector<8x1xf32> to vector<8x32xf32>
    %13 = arith.subf %0, %12 : vector<8x32xf32>
    %14 = math.exp %13 : vector<8x32xf32>
    %cst_4 = arith.constant dense<0.000000e+00> : vector<8xf32>
    %15 = vector.multi_reduction <add>, %14, %cst_4 [1] : vector<8x32xf32> to vector<8xf32>
    %16 = vector.shape_cast %15 : vector<8xf32> to vector<8x1xf32>
    %17 = arith.subf %9, %11 : vector<8x1xf32>
    %18 = math.log %16 : vector<8x1xf32>
    %19 = arith.subf %18, %17 : vector<8x1xf32>
    %cst_5 = arith.constant 0.000000e+00 : f32
    %20 = vector.broadcast %cst_5 : f32 to vector<8x1xf32>
    %21 = arith.subf %20, %19 : vector<8x1xf32>
    %22 = math.exp %21 : vector<8x1xf32>
    %cst_6 = arith.constant 3.000000e-01 : f32
    %23 = vector.broadcast %cst_6 : f32 to vector<8x1xf32>
    %24 = arith.subf %22, %23 : vector<8x1xf32>
    %25 = arith.mulf %24, %24 : vector<8x1xf32>
    %cst_7 = arith.constant 0.000000e+00 : f32
    %26 = vector.broadcast %cst_7 : f32 to vector<8x1xf32>
    %27 = arith.subf %26, %25 : vector<8x1xf32>
    %cst_8 = arith.constant 5.000000e-01 : f32
    %28 = vector.broadcast %cst_8 : f32 to vector<8x1xf32>
    %29 = arith.divf %27, %28 : vector<8x1xf32>
    %30 = math.exp %29 : vector<8x1xf32>
    %cst_9 = arith.constant 2.500000e-01 : f32
    %31 = vector.broadcast %cst_9 : f32 to vector<8x1xf32>
    %32 = arith.mulf %31, %30 : vector<8x1xf32>
    %33 = arith.mulf %32, %19 : vector<8x1xf32>
    %c8_i32 = arith.constant 8 : i32
    %34 = arith.muli %arg0, %c8_i32 : i32
    %35 = tpu.iota {dimensions = array<i32: 0>} : vector<8x1xi32>
    %36 = vector.broadcast %34 : i32 to vector<8x1xi32>
    %37 = arith.addi %36, %35 : vector<8x1xi32>
    %c8_i32_10 = arith.constant 8 : i32
    %38 = vector.broadcast %c8_i32_10 : i32 to vector<8x1xi32>
    %39 = arith.cmpi slt, %37, %38 : vector<8x1xi32>
    %cst_11 = arith.constant 0.000000e+00 : f32
    %40 = vector.broadcast %cst_11 : f32 to vector<8x1xf32>
    %41 = arith.select %39, %33, %40 : vector<8x1xi1>, vector<8x1xf32>
    %42 = vector.shape_cast %41 : vector<8x1xf32> to vector<1x8x1xf32>
    %cst_12 = arith.constant dense<0.000000e+00> : vector<1xf32>
    %43 = vector.multi_reduction <add>, %42, %cst_12 [1, 2] : vector<1x8x1xf32> to vector<1xf32>
    %44 = vector.shape_cast %43 : vector<1xf32> to vector<1x1x1xf32>
    %45 = vector.extract %44[0, 0, 0] : f32 from vector<1x1x1xf32>
    %46 = vector.broadcast %45 : f32 to vector<1x1x1xf32>
    %c0_13 = arith.constant 0 : index
    %c0_14 = arith.constant 0 : index
    %c0_15 = arith.constant 0 : index
    %47 = vector.load %arg3[%c0_13, %c0_14, %c0_15] : memref<1x1x1xf32, #tpu.memory_space<vmem>>, vector<1x1x1xf32>
    tpu.vector_store %arg3[%c0_13, %c0_14, %c0_15], %46 {strides = array<i32>} : memref<1x1x1xf32, #tpu.memory_space<vmem>>, vector<1x1x1xf32>,
    return
  }
  func.func @transform_0(%arg0: i32) -> (i32, i32) {
    %c0_i32 = arith.constant 0 : i32
    %c0_i32_0 = arith.constant 0 : i32
    return %arg0, %c0_i32 : i32, i32
  }
  func.func @transform_1(%arg0: i32) -> (i32, i32) {
    %c0_i32 = arith.constant 0 : i32
    %c0_i32_0 = arith.constant 0 : i32
    return %arg0, %c0_i32 : i32, i32
  }
  func.func @transform_2(%arg0: i32) -> (i32, i32, i32) {
    %c0_i32 = arith.constant 0 : i32
    %c0_i32_0 = arith.constant 0 : i32
    %c0_i32_1 = arith.constant 0 : i32
    return %arg0, %c0_i32, %c0_i32_0 : i32, i32, i32
  }
}

</mosaic_0001>

<bundles_post_ra>
// kernel: tpu_custom_call.1
= control target key start
LH: loop header
LB: loop body
LE: loop exit
PB: predicated region body
PF: predicated region fallthrough
CT: control target
= control target key end

     0   :  { %vm21_vm0 = vcmask 261120   ;;  %s161_s0 = inlined_call_operand.vmem [shape: f32[8,32], index: 0, kind: input, shape index: {}]   ;;  %s162_s1 = inlined_call_operand.vmem [shape: s32[8,1], index: 1, kind: input, shape index: {}]   ;;  %s163_s2 = inlined_call_operand.hbm [shape: f32[1,1,1], index: 2, kind: output, shape index: {}]  }
   0x1   :  { %v12_v0 = vld [vmem:[%s161_s0] sm:$0xff] }
   0x2   :  { %7 = vsyncpa [#allocation3], 0  ;;  %v25_v1 = vsel %vm21_vm0, %v12_v0, -inf  ;;  %v123_v2 = vmov 0   ;;  %v13_v3 = vld [vmem:[%s162_s1] sm:$0xff]  ;;  %v14_v7 = vlaneseq  ;;  %vm57_vm2 = vcmask 7168  }
   0x3   :  { %90 = vset.pattern.permute.xlu0 %v123_v2  ;;  %s124_s0 = smov [#allocation2]   ;;  %vm69_vm3 = vcmask 0  }
   0x4   :  { %26 = vmax.xlane.f32.xlu0 %v25_v1  ;;  %v15_v8 = vand.u32 127, %v14_v7  ;;  %s77_s1 = sshll.u32 %s124_s0, 4  ;;  %s78_s1 = int_to_ptr.vmem [resolvable:$true] %s77_s1 }
   0x5   :  { %s99_s14 = scalar_lea.vmem %s78_s1, 16  ;;  %s103_s15 = scalar_lea.vmem %s78_s1, 32 }
   0x6   :  { %p100_p0 = scmp.ne.s32.totalorder %s78_s1, %s99_s14  ;;  %p104_p1 = scmp.lt.s32.totalorder %s78_s1, %s78_s1 }
   0x7   :  { %p105_p2 = scmp.lt.s32.totalorder %s103_s15, %s99_s14 }
   0x9   :  { %p106_p3 = por %p105_p2, %p104_p1 }
   0xb   :  { %p107_p4 = pnand %p106_p3, %p100_p0 }
  0x1a   :  { %17 = vperm.xlu0 %90, %v13_v3  }
  0x91   :  { %v27_v4 = vpop.xlane.xlu0 %26 }
  0x92   :  { %v28_v5 = vsub.f32 %v12_v0, %v27_v4 }
  0x94   :  { %v29_v6 = vmul.f32 1.442695, %v28_v5 }
  0x96   :  { %91 = vpow2.f32 %v29_v6 }
  0x99   :  { %v18_v9 = vpop.permute.xlu0 %17 }
  0x9a   :  { %vm19_vm1 = vcmp.eq.s32.totalorder %v15_v8, %v18_v9 }
  0x9b   :  { %v20_v11 = vsel %vm19_vm1, %v12_v0, 0.0 }
  0x9c   :  { %v22_v13 = vsel %vm21_vm0, %v20_v11, 0.0 }
  0xa0   :  { %v92_v10 = vpop.eup %91 }
  0xa1   :  { %v31_v12 = vsel %vm21_vm0, %v92_v10, 0.0 }
  0xa2   :  { %32 = vadd.xlane.f32.xlu1 %v31_v12 }
  0xa6   :  { %23 = vadd.xlane.f32.xlu1 %v22_v13 }
 0x12f   :  { %v33_v14 = vpop.xlane.xlu1 %32 }
 0x130   :  { %93 = vlog2.f32 %v33_v14 }
 0x133   :  { %v24_v15 = vpop.xlane.xlu1 %23 }
 0x134   :  { %v34_v18 = vsub.f32 %v24_v15, %v27_v4 }
 0x13a   :  { %v94_v16 = vpop.eup %93 }
 0x13b   :  { %v36_v17 = vmul.f32 0.6931472, %v94_v16 }
 0x13d   :  { %v37_v19 = vsub.f32 %v36_v17, %v34_v18 }
 0x13f   :  { %v38_v20 = vsub.f32 0.0, %v37_v19 }
 0x141   :  { %v39_v21 = vmul.f32 1.442695, %v38_v20 }
 0x143   :  { %95 = vpow2.f32 %v39_v21 }
 0x14d   :  { %v96_v22 = vpop.eup %95 }
 0x14e   :  { %v85_v23 = vadd.f32 -0.3, %v96_v22 }
 0x150   :  { %v42_v24 = vmul.f32 %v85_v23, %v85_v23 }
 0x152   :  { %v43_v25 = vsub.f32 0.0, %v42_v24 }
 0x154   :  { %v45_v26 = vmul.f32 2.0, %v43_v25 }
 0x156   :  { %v46_v27 = vmul.f32 1.442695, %v45_v26 }
 0x158   :  { %97 = vpow2.f32 %v46_v27 }
 0x162   :  { %v98_v28 = vpop.eup %97 }
 0x163   :  { %v48_v29 = vmul.f32 0.25, %v98_v28 }
 0x165   :  { %v49_v30 = vmul.f32 %v48_v29, %v37_v19 }
 0x167   :  { %v58_v31 = vsel %vm57_vm2, %v49_v30, 0.0 }
 0x168   :  { %59 = vadd.xlane.f32.xlu1 %v58_v31 }
 0x1f5   :  { %v60_v32 = vpop.xlane.xlu1 %59 }
 0x1f6   :  { %v61_v33 = vrot.slane %v60_v32, 4 }
 0x1f8   :  { %v62_v34 = vadd.f32 %v61_v33, %v60_v32 }
 0x1fa   :  { %v63_v35 = vrot.slane %v62_v34, 2 }
 0x1fc   :  { %v64_v36 = vadd.f32 %v63_v35, %v62_v34 }
 0x1fe   :  { %v65_v37 = vrot.slane %v64_v36, 1 }
 0x200   :  { %v66_v38 = vadd.f32 %v65_v37, %v64_v36 }
 0x202   :  { %86 = vpush %v66_v38 }
 0x233   :  { %s87_s13 = spop %86 }
 0x234   :  { %v68_v39 = vstv %s87_s13 }
 0x235   :  { %70 = vst.msk [vmem:[#allocation2] sm:$0x1] %vm69_vm3, %v68_v39 }
 0x236   :  { %110 = shalt.err (!%p107_p4)
}
 0x237   :  { %s111_s18 = scalar_lea.hbm %s163_s2, 16 }
 0x238   :  { %p112_p5 = scmp.ne.s32.totalorder %s163_s2, %s111_s18  ;;  %p115_p6 = scmp.lt.u32.totalorder %s111_s18, %s163_s2 }
 0x23a   :  { %p117_p7 = pnand %p115_p6, %p112_p5 }
 0x23c   :  { %120 = shalt.err (!%p117_p7)
}
 0x23d   :  { %80 = dma.vmem_to_hbm [thread:$0]  %s78_s1, 16, %s163_s2, [#allocation3]  }
 0x23e   :  { %121 = dma.done.wait [#allocation3], 16  }
 0x23f   :  { %122 = vsyncadd [#allocation3], 4294967280 }
 0x240   :  { %84 = vsyncpa [#allocation3], 1 }

</bundles_post_ra>
